<compile_context>
chip_gen: v6e
topology: v6e:2x2x1
jax: 0.10.0
libtpu: 0.0.40
codegen_flags: <defaults>
</compile_context>

<pallas_src>
import jax
import jax.numpy as jnp
from jax.experimental import pallas as pl
from jax.experimental.pallas import tpu as pltpu

NUM_F = 10                      # numerical features (14 - 4 embedded scalars)
PT_F, RT_F, BT_F, HR_F = 13, 2, 10, 3
CAT_F = NUM_F + PT_F + RT_F + BT_F + HR_F   # 38
HID = 8
OUT = 1


def _round_up(x, m):
    return ((x + m - 1) // m) * m


# ----------------------------------------------------------------------------
# Kernel: one batch tile, features-major.
#   x_ref  : [CAT_F, b_tile]  packed inputs (batch on the lane axis)
#   w1t_ref: [HID, CAT_F]     fused first-layer weights (embeddings folded in)
#   b1_ref : [HID, 1]         fused first-layer bias
#   w2_ref : [HID, 1]         second-layer weights
#   b2_ref : [1, 1]           second-layer bias
#   out_ref: [1, b_tile]      lane-dense output
# ----------------------------------------------------------------------------
def mlp_baseline_kernel(x_ref, w1t_ref, b1_ref, w2_ref, b2_ref, out_ref):
    # Layer 1 on the MXU: [8, 38] @ [38, b_tile] -> [8, b_tile] (N lane-dense).
    h = jnp.dot(w1t_ref[...], x_ref[...], preferred_element_type=jnp.float32)
    h = jnp.maximum(h + b1_ref[...], 0.0)
    # Layer 2 (8 -> 1) on the VPU: broadcast-mul + sublane reduce; avoids an
    # N=1 MXU push while keeping the result lane-dense.
    y = jnp.sum(h * w2_ref[...], axis=0, keepdims=True) + b2_ref[...]
    out_ref[...] = jnp.maximum(y, 0.0).astype(out_ref.dtype)


# ----------------------------------------------------------------------------
# Exact algebraic fold of the 4 embedding linears into the first MLP layer.
# ----------------------------------------------------------------------------
def fuse_params(params):
    w1 = params["w1"]                                   # [14, 8]
    w1_num = w1[0:NUM_F, :]
    c_pt = w1[NUM_F + 0:NUM_F + 1, :]
    c_rt = w1[NUM_F + 1:NUM_F + 2, :]
    c_bt = w1[NUM_F + 2:NUM_F + 3, :]
    c_hr = w1[NUM_F + 3:NUM_F + 4, :]
    w1_fused = jnp.concatenate([
        w1_num,                                         # [10, 8]
        params["pt_w"] @ c_pt,                          # [13, 8]
        params["rt_w"] @ c_rt,                          # [2, 8]
        params["bt_w"] @ c_bt,                          # [10, 8]
        params["hr_w"] @ c_hr,                          # [3, 8]
    ], axis=0)                                          # [38, 8]
    b1_fused = (params["b1"] + params["pt_b"] @ c_pt + params["rt_b"] @ c_rt
                + params["bt_b"] @ c_bt + params["hr_b"] @ c_hr)   # [1, 8]
    return {
        "w1t": w1_fused.T,                              # [8, 38]
        "b1": b1_fused.T,                               # [8, 1]
        "w2": params["w2"],                             # [8, 1]
        "b2": params["b2"],                             # [1, 1]
    }


def mlp_baseline_forward(numerical_input, host_response_time_input,
                         property_type_input, room_type_input,
                         bathrooms_text_input, params, *, b_tile=512):
    B = numerical_input.shape[0]
    fused = fuse_params(params)

    # Pack all per-example inputs into a single [B, 38] array, then go
    # features-major so the batch lands on the lane axis.
    x = jnp.concatenate(
        [numerical_input, property_type_input, room_type_input,
         bathrooms_text_input, host_response_time_input],
        axis=1).astype(jnp.float32)                     # [B, 38]
    xt = x.T                                            # [38, B]

    # Tile selection: lane axis must be a multiple of 128; keep >=2 grid steps
    # when the batch allows so v7x can shard the parallel axis over both TCs.
    bp128 = _round_up(B, 128)
    bt = min(_round_up(b_tile, 128), bp128)
    if bp128 // bt < 2 and bp128 >= 256:
        bt = _round_up(bp128 // 2, 128)
    b_pad = _round_up(B, bt)
    if b_pad != B:
        xt = jnp.pad(xt, ((0, 0), (0, b_pad - B)))
    nb = b_pad // bt

    out_t = pl.pallas_call(
        mlp_baseline_kernel,
        out_shape=jax.ShapeDtypeStruct((1, b_pad), jnp.float32),
        grid=(nb,),
        in_specs=[
            pl.BlockSpec((CAT_F, bt), lambda i: (0, i)),            # x tile
            pl.BlockSpec(fused["w1t"].shape, lambda i: (0, 0)),      # weights
            pl.BlockSpec(fused["b1"].shape, lambda i: (0, 0)),
            pl.BlockSpec(fused["w2"].shape, lambda i: (0, 0)),
            pl.BlockSpec(fused["b2"].shape, lambda i: (0, 0)),
        ],
        out_specs=pl.BlockSpec((1, bt), lambda i: (0, i)),
        compiler_params=pltpu.CompilerParams(
            dimension_semantics=("parallel",)),
    )(xt, fused["w1t"], fused["b1"], fused["w2"], fused["b2"])

    return out_t[:, :B].T                               # [B, 1]


def init_params(key):
    """Deterministic init mirroring the nn.Linear shapes in MLP_Baseline.

    Weights are stored as [in_features, out_features] (transposed vs. PyTorch)."""
    def linear(k, fan_in, fan_out):
        kw, kb = jax.random.split(k)
        bound = 1.0 / jnp.sqrt(fan_in)
        w = jax.random.uniform(kw, (fan_in, fan_out), jnp.float32, -bound, bound)
        b = jax.random.uniform(kb, (1, fan_out), jnp.float32, -bound, bound)
        return w, b

    ks = jax.random.split(key, 6)
    params = {}
    params["pt_w"], params["pt_b"] = linear(ks[0], PT_F, 1)   # property_type_embeddings
    params["rt_w"], params["rt_b"] = linear(ks[1], RT_F, 1)   # room_type_embeddings
    params["bt_w"], params["bt_b"] = linear(ks[2], BT_F, 1)   # bathrooms_embeddings
    params["hr_w"], params["hr_b"] = linear(ks[3], HR_F, 1)   # host_response_time
    params["w1"], params["b1"] = linear(ks[4], NUM_F + 4, HID)  # listings_mlp
    params["w2"], params["b2"] = linear(ks[5], HID, OUT)        # listings_mlp_second
    return params


def reference_forward(numerical, hr, pt, rt, bt, params):
    """Plain JAX reference matching the PyTorch forward exactly."""
    pt_e = pt @ params["pt_w"] + params["pt_b"]
    rt_e = rt @ params["rt_w"] + params["rt_b"]
    bt_e = bt @ params["bt_w"] + params["bt_b"]
    hr_e = hr @ params["hr_w"] + params["hr_b"]
    x = jnp.concatenate([numerical, pt_e, rt_e, bt_e, hr_e], axis=1)
    x = jax.nn.relu(x @ params["w1"] + params["b1"])
    x = jax.nn.relu(x @ params["w2"] + params["b2"])
    return x


if __name__ == "__main__":
    key = jax.random.PRNGKey(0)
    k_param, k_num, k_pt, k_rt, k_bt, k_hr, k_txt = jax.random.split(key, 7)

    params = init_params(k_param)

    B = 256  # small demo batch; tiles to two 128-wide lane blocks
    numerical_input = jax.random.normal(k_num, (B, NUM_F), jnp.float32)
    property_type_input = jax.random.normal(k_pt, (B, PT_F), jnp.float32)
    room_type_input = jax.random.normal(k_rt, (B, RT_F), jnp.float32)
    bathrooms_text_input = jax.random.normal(k_bt, (B, BT_F), jnp.float32)
    host_response_time_input = jax.random.normal(k_hr, (B, HR_F), jnp.float32)

    # reviews / description / neighborhood_overview are accepted by the PyTorch
    # forward but never used; construct dummies to mirror the signature.
    reviews = jax.random.normal(k_txt, (B, 8), jnp.float32)
    description = reviews
    neighborhood_overview = reviews

    out = mlp_baseline_forward(
        numerical_input, host_response_time_input, property_type_input,
        room_type_input, bathrooms_text_input, params)
    out = jax.block_until_ready(out)

    ref = reference_forward(numerical_input, host_response_time_input,
                            property_type_input, room_type_input,
                            bathrooms_text_input, params)
    assert out.shape == (B, OUT)
    assert jnp.allclose(out, ref, atol=1e-4, rtol=1e-4), (out, ref)

    print("KERNEL_OK")
</pallas_src>

<mosaic_0001>
module attributes {stable_mosaic.version = 11 : i64} {
  func.func @mlp_baseline_kernel(%arg0: i32, %arg1: memref<38x128xf32, #tpu.memory_space<vmem>>, %arg2: memref<8x38xf32, #tpu.memory_space<vmem>>, %arg3: memref<8x1xf32, #tpu.memory_space<vmem>>, %arg4: memref<8x1xf32, #tpu.memory_space<vmem>>, %arg5: memref<1x1xf32, #tpu.memory_space<vmem>>, %arg6: memref<1x128xf32, #tpu.memory_space<vmem>>) attributes {dimension_semantics = [#tpu.dimension_semantics<parallel>], iteration_bounds = array<i64: 2>, scalar_prefetch = 0 : i64, scratch_operands = 0 : i64, tpu.core_type = #tpu.core_type<tc>, window_params = [{transform_indices = @transform_0, window_bounds = array<i64: 38, 128>}, {pipeline_mode = #tpu.pipeline_mode<synchronous>, transform_indices = @transform_1, window_bounds = array<i64: 8, 38>}, {pipeline_mode = #tpu.pipeline_mode<synchronous>, transform_indices = @transform_2, window_bounds = array<i64: 8, 1>}, {pipeline_mode = #tpu.pipeline_mode<synchronous>, transform_indices = @transform_3, window_bounds = array<i64: 8, 1>}, {pipeline_mode = #tpu.pipeline_mode<synchronous>, transform_indices = @transform_4, window_bounds = array<i64: 1, 1>}, {transform_indices = @transform_5, window_bounds = array<i64: 1, 128>}]} {
    %c0 = arith.constant 0 : index
    %c0_0 = arith.constant 0 : index
    %0 = vector.load %arg2[%c0, %c0_0] : memref<8x38xf32, #tpu.memory_space<vmem>>, vector<8x38xf32>
    %c0_1 = arith.constant 0 : index
    %c0_2 = arith.constant 0 : index
    %1 = vector.load %arg1[%c0_1, %c0_2] : memref<38x128xf32, #tpu.memory_space<vmem>>, vector<38x128xf32>
    %cst = arith.constant dense<0.000000e+00> : vector<8x128xf32>
    %2 = tpu.matmul %0, %1, %cst {dimension_numbers = #tpu.dot_dimension_numbers<[1], [0], [0], [1], [0, 0, 1, 1], [], []>} : vector<8x38xf32>, vector<38x128xf32>, vector<8x128xf32> -> vector<8x128xf32>
    %c0_3 = arith.constant 0 : index
    %c0_4 = arith.constant 0 : index
    %3 = vector.load %arg3[%c0_3, %c0_4] : memref<8x1xf32, #tpu.memory_space<vmem>>, vector<8x1xf32>
    %4 = vector.broadcast %3 : vector<8x1xf32> to vector<8x128xf32>
    %5 = arith.addf %2, %4 : vector<8x128xf32>
    %cst_5 = arith.constant 0.000000e+00 : f32
    %6 = vector.broadcast %cst_5 : f32 to vector<8x128xf32>
    %7 = arith.maximumf %5, %6 : vector<8x128xf32>
    %c0_6 = arith.constant 0 : index
    %c0_7 = arith.constant 0 : index
    %8 = vector.load %arg4[%c0_6, %c0_7] : memref<8x1xf32, #tpu.memory_space<vmem>>, vector<8x1xf32>
    %9 = vector.broadcast %8 : vector<8x1xf32> to vector<8x128xf32>
    %10 = arith.mulf %7, %9 : vector<8x128xf32>
    %cst_8 = arith.constant dense<0.000000e+00> : vector<128xf32>
    %11 = vector.multi_reduction <add>, %10, %cst_8 [0] : vector<8x128xf32> to vector<128xf32>
    %12 = vector.shape_cast %11 : vector<128xf32> to vector<1x128xf32>
    %c0_9 = arith.constant 0 : index
    %c0_10 = arith.constant 0 : index
    %13 = vector.load %arg5[%c0_9, %c0_10] : memref<1x1xf32, #tpu.memory_space<vmem>>, vector<1x1xf32>
    %14 = vector.broadcast %13 : vector<1x1xf32> to vector<1x128xf32>
    %15 = arith.addf %12, %14 : vector<1x128xf32>
    %cst_11 = arith.constant 0.000000e+00 : f32
    %16 = vector.broadcast %cst_11 : f32 to vector<1x128xf32>
    %17 = arith.maximumf %15, %16 : vector<1x128xf32>
    %c0_12 = arith.constant 0 : index
    %c0_13 = arith.constant 0 : index
    %18 = vector.load %arg6[%c0_12, %c0_13] : memref<1x128xf32, #tpu.memory_space<vmem>>, vector<1x128xf32>
    tpu.vector_store %arg6[%c0_12, %c0_13], %17 {strides = array<i32>} : memref<1x128xf32, #tpu.memory_space<vmem>>, vector<1x128xf32>,
    return
  }
  func.func @transform_0(%arg0: i32) -> (i32, i32) {
    %c0_i32 = arith.constant 0 : i32
    %c0_i32_0 = arith.constant 0 : i32
    return %c0_i32, %arg0 : i32, i32
  }
  func.func @transform_1(%arg0: i32) -> (i32, i32) {
    %c0_i32 = arith.constant 0 : i32
    %c0_i32_0 = arith.constant 0 : i32
    %c0_i32_1 = arith.constant 0 : i32
    return %c0_i32, %c0_i32_0 : i32, i32
  }
  func.func @transform_2(%arg0: i32) -> (i32, i32) {
    %c0_i32 = arith.constant 0 : i32
    %c0_i32_0 = arith.constant 0 : i32
    %c0_i32_1 = arith.constant 0 : i32
    return %c0_i32, %c0_i32_0 : i32, i32
  }
  func.func @transform_3(%arg0: i32) -> (i32, i32) {
    %c0_i32 = arith.constant 0 : i32
    %c0_i32_0 = arith.constant 0 : i32
    %c0_i32_1 = arith.constant 0 : i32
    return %c0_i32, %c0_i32_0 : i32, i32
  }
  func.func @transform_4(%arg0: i32) -> (i32, i32) {
    %c0_i32 = arith.constant 0 : i32
    %c0_i32_0 = arith.constant 0 : i32
    %c0_i32_1 = arith.constant 0 : i32
    return %c0_i32, %c0_i32_0 : i32, i32
  }
  func.func @transform_5(%arg0: i32) -> (i32, i32) {
    %c0_i32 = arith.constant 0 : i32
    %c0_i32_0 = arith.constant 0 : i32
    return %c0_i32, %arg0 : i32, i32
  }
}

</mosaic_0001>

<bundles_post_ra>
// kernel: tpu_custom_call.1
= control target key start
LH: loop header
LB: loop body
LE: loop exit
PB: predicated region body
PF: predicated region fallthrough
CT: control target
= control target key end

     0   :  { %s805_s0 = inlined_call_operand.hbm [shape: f32[38,256], index: 0, kind: input, shape index: {}]   ;;  %s806_s1 = inlined_call_operand.vmem [shape: f32[8,38], index: 1, kind: input, shape index: {}]   ;;  %s807_s2 = inlined_call_operand.vmem [shape: f32[8,1], index: 2, kind: input, shape index: {}]   ;;  %s808_s3 = inlined_call_operand.vmem [shape: f32[8,1], index: 3, kind: input, shape index: {}]   ;;  %s809_s4 = inlined_call_operand.<no memory space> [shape: f32[1,1], index: 4, kind: input, shape index: {}]   ;;  %s810_s5 = inlined_call_operand.hbm [shape: f32[1,256], index: 5, kind: output, shape index: {}]  }
   0x1   :  { %v10_v0 = vstv %s809_s4 }
   0x2   :  { %11 = vst [vmem:[#allocation2] sm:$0x1] %v10_v0 }
   0x3   :  { %12 = vsyncpa [#allocation4], 0 }
   0x4   :  { %14 = vsyncpa [#allocation4 + $0x1], 0 }
   0x5   :  { %15 = vsyncpa [#allocation5], 0 }
   0x6   :  { %17 = vsyncpa [#allocation5 + $0x1], 0  ;;  %s659_s20 = smov 0   ;;  %s661_s21 = smov 0  }
   0x7   :  { %s663_s22 = smov 0   ;;  %s665_s23 = smov 0  }
   0x8 LB: > { %s680_s4 = sadd.s32 4294967295, %s616_s23   ;;  %s439_s24 = sadd.s32 4294967294, %s616_s23   ;;  %s616_s23 = sphi %s665_s23, %s825_s23   ;;  %s612_s22 = sphi %s663_s22, %s824_s22   ;;  %s608_s21 = sphi %s661_s21, %s823_s21   ;;  %s604_s20 = sphi %s659_s20, %s822_s20  }
   0x9   : > { %s684_s25 = sadd.s32 1, %s616_s23   ;;  %s30_s26 = sadd.s32 1, %s612_s22 }
   0xa   : > { %s27_s27 = ssub.s32 %s616_s23, %s684_s25  ;;  %p37_p0 = scmp.ne.s32.totalorder %s612_s22, %s608_s21 }
   0xb   : > { %p28_p1 = scmp.eq.s32.totalorder %s27_s27, 0  ;;  %p38_p2 = scmp.eq.s32.totalorder %s616_s23, 0 }
   0xc   : > { %p43_p3 = scmp.ne.s32.totalorder %s608_s21, %s604_s20  ;;  %p44_p4 = scmp.eq.s32.totalorder %s680_s4, 0 }
   0xd   : > { %s696_s28 = scalar_select %p28_p1, %s612_s22, %s30_s26  }
   0xe   : > { %p39_p5 = por %p38_p2, %p37_p0  ;;  %p698_p6 = por %p44_p4, %p43_p3 }
   0xf   : > { %p151_p7 = scmp.eq.s32.totalorder %s680_s4, 1  ;;  %p157_p8 = scmp.eq.s32.totalorder %s439_s24, 1 }
  0x10   : > { %s813_s29 = scalar_select %p698_p6, 1, 0 }
  0x11   : > { %p482_p10 = scmp.lt.s32.totalorder %s616_s23, 2  ;;  %p705_p11 = por %p151_p7, %p37_p0 }
  0x12   : > { %p709_p12 = por %p157_p8, %p43_p3  ;;  %s189_s7 = sand.u32 1, %s612_s22  }
  0x13   : > { %s814_s30 = scalar_select %p705_p11, 1, 0 }
  0x14   : > { %s815_s6 = scalar_select %p709_p12, 1, 0 }
  0x15   : > { %s442_s8 = sshll.u32 %s616_s23, 7  ;;  %s468_s9 = smul.u32 40, %s189_s7 }
  0x16   : > { %s718_s12 = scalar_lea.hbm %s805_s0, %s442_s8  ;;  %p720_p13 = pnand %p482_p10, %p39_p5 }
  0x17   : > { %s193_s14 = scalar_lea.vmem [#allocation3], %s468_s9  ;;  %s727_s16 = scalar_lea.sflag [#allocation4], %s189_s7 }
  0x18   : > { %s199_s15 = sshll.u32 %s193_s14, 4  ;;  %s524_s17 = scalar_lea.hbm %s718_s12, 640  ;;  %s724_s15 = int_to_ptr.vmem [resolvable:$true] %s199_s15 }
  0x19   : > { %p525_p1 = scmp.ne.s32.totalorder %s718_s12, %s524_s17  ;;  %p526_p2 = pneg %p720_p13 }
  0x1a   : > { %s529_s24 = scalar_lea.hbm %s805_s0, 1280  ;;  %p530_p5 = scmp.lt.s32.totalorder %s718_s12, %s805_s0 }
  0x1b   : > { %p527_p3 = pnand %p526_p2, %p525_p1  ;;  %p531_p7 = scmp.lt.s32.totalorder %s529_s24, %s524_s17 }
  0x1d   : > { %p528_p4 = pneg %p527_p3  ;;  %p532_p8 = por %p531_p7, %p530_p5 }
  0x1f   : > { %p533_p10 = pnand %p532_p8, %p528_p4 }
  0x21   : > { %536 = shalt.err (!%p533_p10)
}
  0x22   : > { %s537_s7 = scalar_lea.vmem %s724_s15, 640  ;;  %s618_s8 = smov [#allocation3]  }
  0x23   : > { %p538_p9 = scmp.ne.s32.totalorder %s724_s15, %s537_s7  ;;  %s542_s9 = sshll.u32 %s618_s8, 4  ;;  %s543_s9 = int_to_ptr.vmem [resolvable:$false] %s542_s9 }
  0x24   : > { %s544_s10 = scalar_lea.vmem %s543_s9, 1280  ;;  %p545_p3 = scmp.lt.s32.totalorder %s724_s15, %s543_s9 }
  0x25   : > { %p540_p0 = pnand %p538_p9, %p526_p2  ;;  %p546_p12 = scmp.lt.s32.totalorder %s544_s10, %s537_s7 }
  0x27   : > { %p541_p1 = pneg %p540_p0  ;;  %p547_p11 = por %p546_p12, %p545_p3 }
  0x29   : > { %p548_p6 = pnand %p547_p11, %p541_p1 }
  0x2b   : > { %551 = shalt.err (!%p548_p6)
}
  0x2c   : > { %s619_s11 = smov 256   ;;  %s620_s14 = smov 128  }
  0x2d   : > { %s621_s17 = smov 8   ;;  %p207_p9 = scmp.lt.s32.totalorder %s616_s23, 3 }
  0x2e   : > { %477 = dma.hbm_to_vmem [thread:$0]  (!%p720_p13), %s718_s12, 640, %s724_s15, %s727_s16, %s619_s11, %s620_s14, %s621_s17  }
  0x2f   : > { %p817_p0 = scmp.ge.s32.totalorder %s616_s23, 1 }
  0x31   : > { %p208_p2 = pnand %p817_p0, %p207_p9 }
  0x32   : > { %s752_s18 = sand.u32 (!%p208_p2), 1, %s608_s21   ;;  %p818_p6 = scmp.ne.s32.totalorder (!%p208_p2), %s813_s29, 0 }
  0x33   : > { %211 = sbr.rel (%p208_p2) target bundleno = 297 (0x129), region = 40  ;;  %s214_s24 = scalar_lea.sflag (!%p208_p2), [#allocation4], %s752_s18 }
  0x34   : > { %s469_s19 = smul.u32 (!%p208_p2), 40, %s752_s18 }
  0x36   : > { %s217_s26 = scalar_lea.vmem (!%p208_p2), [#allocation3], %s469_s19 }
  0x38   : > { %595 = dma.done.wait (%p818_p6), %s214_s24, 640  }
  0x39   : > { %597 = vsyncadd (%p818_p6), %s214_s24, 4294966656  ;;  %v622_v1 = vmov 0.0   ;;  %vm623_vm0 = vmmov 0   ;;  %v624_v2 = vmov 0   ;;  %vm259_vm1 = vcmask 1045504   ;;  %v247_v4 = vld [vmem:[%s217_s26 + $0x18] sm:$0xff] }
  0x3a   : > { %455 = vmatprep.subr.mxu0 %v622_v1  ;;  %465 = vmatprep.mubr.msk.f32.mxu0 %vm623_vm0, %v622_v1  ;;  %v248_v3 = vld [vmem:[%s217_s26 + $0x20] sm:$0x3f]  ;;  %v246_v5 = vld [vmem:[%s217_s26 + $0x10] sm:$0xff]  ;;  %v245_v8 = vld [vmem:[%s217_s26 + $0x8] sm:$0xff]  ;;  %vm255_vm2 = vcmask 310272   ;;  %v353_v17 = vlaneseq  ;;  %s446_s7 = sshll.u32 %s680_s4, 4 }
  0x3b   : > { %522 = vset.pattern.permute.xlu0 %v624_v2  ;;  %523 = vset.pattern.permute.xlu1 %v624_v2  ;;  %v249_v6 = vld [vmem:[%s807_s2] sm:$0xff]  ;;  %s242_s8 = scalar_lea.vmem [#allocation6], %s752_s18  ;;  %s371_s14 = scalar_lea.hbm %s810_s5, %s446_s7 }
  0x3c   : > { %456 = vmatpush3.msk.msra.mxu0 %vm259_vm1, %v248_v3  ;;  %v347_v7 = vld [vmem:[#allocation2] sm:$0x1]  ;;  %252 = vperm.xlu0 %522, %v249_v6   ;;  %v244_v10 = vld [vmem:[%s217_s26] sm:$0xff]  ;;  %v354_v21 = vshrl.u32 %v353_v17, 7  ;;  %s373_s9 = sshll.u32 %s242_s8, 4  ;;  %s361_s17 = scalar_lea.sflag [#allocation5], %s752_s18  ;;  %s374_s9 = int_to_ptr.vmem [resolvable:$true] %s373_s9 }
  0x3d   : > { %457 = vmatprep.subr.mxu0 %v622_v1  ;;  %v334_v9 = vld [vmem:[%s808_s3] sm:$0xff]  ;;  %350 = vperm.xlu1 %523, %v347_v7   ;;  %s552_s19 = scalar_lea.vmem %s374_s9, 16  ;;  %p819_p12 = scmp.ne.s32.totalorder %s814_s30, 0 }
  0x3e   : > { %458 = vmatpush3.msra.mxu0 %v247_v4  ;;  %v243_v11 = vld [vmem:[%s806_s1] sm:$0xff]  ;;  %v355_v24 = vsub.s32 0, %v354_v21  ;;  %p553_p11 = scmp.ne.s32.totalorder %s374_s9, %s552_s19  ;;  %s625_s24 = smov [#allocation6]  }
  0x3f   : > { %459 = vmatprep.subr.mxu0 %v622_v1  ;;  %s556_s26 = sshll.u32 %s625_s24, 4  ;;  %s557_s26 = int_to_ptr.vmem [resolvable:$false] %s556_s26 }
  0x40   : > { %460 = vmatpush3.msra.mxu0 %v246_v5  ;;  %337 = vperm.xlu0 %522, %v334_v9   ;;  %p554_p13 = pnand %p553_p11, %p819_p12  ;;  %s558_s4 = scalar_lea.vmem %s557_s26, 32 }
  0x41   : > { %461 = vmatprep.subr.mxu0 %v622_v1  ;;  %p559_p5 = scmp.lt.s32.totalorder %s374_s9, %s557_s26  ;;  %p560_p7 = scmp.lt.s32.totalorder %s558_s4, %s552_s19 }
  0x42   : > { %462 = vmatpush3.msra.mxu0 %v245_v8  ;;  %p555_p4 = pneg %p554_p13 }
  0x43   : > { %463 = vmatprep.subr.mxu0 %v622_v1  ;;  %p561_p8 = por %p560_p7, %p559_p5 }
  0x44   : > { %464 = vmatpush3.msra.mxu0 %v244_v10 }
  0x45   : > { %466 = vmatmul.mubr.msk.f32.vlgmr.msra.gmra.mxu0 %vm255_vm2, %v243_v11  ;;  %p562_p10 = pnand %p561_p8, %p555_p4 }
  0xb7   : > { %v253_v12 = vpop.permute.xlu0 %252 }
  0xb8   : > { %v351_v25 = vpop.permute.xlu1 %350 }
  0xb9   : > { %v356_v28 = vrot.slane %v351_v25, %v355_v24 }
  0xbb   : > { %v338_v18 = vpop.permute.xlu0 %337 }
 0x105   : > { %v329_v13 = vpop.f32.mrf.mxu0 }
 0x106   : > { %v330_v14 = vadd.f32 %v329_v13, %v253_v12 }
 0x107   : > { %v467_v15 = vpop.f32.mrf.mxu0 }
 0x108   : > { %v333_v16 = vmax.f32 %v330_v14, 0.0 }
 0x10a   : > { %v340_v19 = vmul.f32 %v338_v18, %v333_v16 }
 0x10c   : > { %v341_v20 = vrot.slane %v340_v19, 4 }
 0x10e   : > { %v342_v22 = vadd.f32 %v341_v20, %v340_v19 }
 0x110   : > { %v343_v23 = vrot.slane %v342_v22, 2 }
 0x112   : > { %v344_v26 = vadd.f32 %v343_v23, %v342_v22 }
 0x114   : > { %v345_v27 = vrot.slane %v344_v26, 1 }
 0x116   : > { %v346_v29 = vadd.f32 %v345_v27, %v344_v26 }
 0x118   : > { %v357_v30 = vadd.f32 %v356_v28, %v346_v29 }
 0x11a   : > { %v358_v31 = vmax.f32 %v357_v30, 0.0 }
 0x11c   : > { %359 = vst [vmem:[%s242_s8] sm:$0x1] %v358_v31 }
 0x11d   : > { %565 = shalt.err (!%p562_p10)
}
 0x11e   : > { %s566_s12 = scalar_lea.hbm %s371_s14, 16  ;;  %s570_s29 = scalar_lea.hbm %s810_s5, 32 }
 0x11f   : > { %p567_p1 = scmp.ne.s32.totalorder %s371_s14, %s566_s12  ;;  %p571_p0 = scmp.lt.s32.totalorder %s371_s14, %s810_s5 }
 0x120   : > { %p572_p2 = scmp.lt.s32.totalorder %s570_s29, %s566_s12 }
 0x121   : > { %p568_p3 = pnand %p567_p1, %p819_p12 }
 0x122   : > { %p573_p6 = por %p572_p2, %p571_p0 }
 0x123   : > { %p569_p9 = pneg %p568_p3 }
 0x125   : > { %p574_p11 = pnand %p573_p6, %p569_p9 }
 0x127   : > { %577 = shalt.err (!%p574_p11)
}
 0x128   : > { %472 = dma.vmem_to_hbm [thread:$0]  (%p819_p12), %s374_s9, 16, %s371_s14, %s361_s17  }
 0x129 PF: > { %s385_s27 = sand.u32 1, %s604_s20   ;;  %p820_p13 = scmp.ne.s32.totalorder %s815_s6, 0 }
 0x12a   : > { %p821_p4 = scmp.ge.s32.totalorder %s616_s23, 2  ;;  %s386_s7 = scalar_lea.sflag [#allocation5], %s385_s27 }
 0x12c   : > { %p479_p5 = pnand %p821_p4, %p820_p13 }
 0x12e   : > { %p480_p7 = pneg %p479_p5 }
 0x130   : > { %599 = dma.done.wait (%p480_p7), %s386_s7, 16  }
 0x131   : > { %601 = vsyncadd (%p480_p7), %s386_s7, 4294967280  ;;  %p20_p8 = scmp.ge.s32.totalorder %s684_s25, 4   ;;  %s822_s20 = smov %s608_s21 }
 0x132   : > { %s823_s21 = smov %s612_s22  ;;  %s824_s22 = smov %s696_s28 }
 0x133   : > { %s825_s23 = smov %s684_s25  ;;  %22 = sbr.rel (!%p20_p8) target bundleno = 8 (0x8), region = 85 }
 0x138   :  { %390 = vsyncpa [#allocation4], 1 }
 0x139   :  { %392 = vsyncpa [#allocation4 + $0x1], 1 }
 0x13a   :  { %393 = vsyncpa [#allocation5], 1 }
 0x13b   :  { %395 = vsyncpa [#allocation5 + $0x1], 1 }

</bundles_post_ra>
